<compile_context>
chip_gen: v5e
topology: v5e:2x2
jax: 0.10.0
libtpu: 0.0.40
codegen_flags: <defaults>
</compile_context>

<pallas_src>
import math
import jax
import jax.numpy as jnp
from jax import lax
from jax.experimental import pallas as pl
from jax.experimental.pallas import tpu as pltpu  # noqa: F401  (TPU backend)

# ----------------------------- configuration --------------------------------
B = 2            # batch
S = 8            # sequence length
H = 32           # hid_dim
NH = 4           # n_heads
HD = H // NH     # head_dim
PF = 64          # pf_dim
EPS = 1e-5       # nn.LayerNorm default eps
BS = B * S
INV_SCALE = 1.0 / math.sqrt(HD)
NEG_INF = -1e10
LOG2_S = int(math.log2(S))
assert (1 << LOG2_S) == S, "S must be a power of two for the in-kernel shift"


# ------------------------------- kernel -------------------------------------
def encoder_layer_kernel(
    x_ref,       # (BS, H)      activations
    keep_ref,    # (1, BS)      key-side padding mask (1 = keep)
    wqkvo_ref,   # (2H, 4H)     rows 0:H = [wq|wk|wv|pad], rows H:2H = [wo|pad]
    wffn_ref,    # (H+PF, PF)   rows 0:H = w1, rows H:H+PF lanes 0:H = w2
    vecs_ref,    # (8, 4H)      packed biases / LayerNorm params
    out_ref,     # (BS, H)
):
    x = x_ref[...]                        # f32 (BS, H)
    vecs = vecs_ref[...]                  # f32 (8, 4H)
    wqkvo = wqkvo_ref[...]                # f32 (2H, 4H)

    # ---- fused QKV projection: one MXU pass over the 128-lane-wide slab ----
    # lanes 3H:4H of the slab rows 0:H are zero, so that part of the result is
    # unused padding (ignored below).
    proj = jnp.dot(x, wqkvo[0:H, :],
                   preferred_element_type=jnp.float32) + vecs[0:1, :]
    q = proj[:, 0:H] * INV_SCALE          # scale folded into Q once
    k = proj[:, H:2 * H]
    v = proj[:, 2 * H:3 * H]
    wo = wqkvo[H:2 * H, 0:H]              # (H, H), lane offset 0 / sublane 32
    bo = vecs[0:1, 3 * H:4 * H]

    # ---- additive attention bias built in-kernel (no dense (BS,BS) input) --
    # block-diagonal over batches + key padding mask.
    rowb = lax.broadcasted_iota(jnp.int32, (BS, BS), 0)
    colb = lax.broadcasted_iota(jnp.int32, (BS, BS), 1)
    same_batch = (rowb >> LOG2_S) == (colb >> LOG2_S)     # token // S, S = 2^k
    keep = keep_ref[...] > 0.5                            # (1, BS) bool
    bias = jnp.where(same_batch & keep, 0.0, NEG_INF).astype(jnp.float32)

    # ---- per-head attention; both batch elements processed together.
    # Cross-batch attention is killed by the additive bias, so no batch loop.
    ctxs = []
    for h in range(NH):
        lo = h * HD
        qh = q[:, lo:lo + HD]             # (BS, HD)
        kh = k[:, lo:lo + HD]
        vh = v[:, lo:lo + HD]
        # q @ k^T with the transpose folded into dot_general (no XLU .T)
        energy = lax.dot_general(
            qh, kh, (((1,), (1,)), ((), ())),
            preferred_element_type=jnp.float32) + bias     # (BS, BS)
        e_max = jnp.max(energy, axis=-1, keepdims=True)
        p = jnp.exp(energy - e_max)
        denom = jnp.sum(p, axis=-1, keepdims=True)
        attn = p / denom                  # exact divide (denominator is tiny)
        ctxs.append(jnp.dot(attn, vh, preferred_element_type=jnp.float32))

    # head-concatenate restored: one (BS,H) x (H,H) output-projection matmul
    ctx = jnp.concatenate(ctxs, axis=1)                    # (BS, H)
    attn_out = jnp.dot(ctx, wo, preferred_element_type=jnp.float32) + bo

    # ---- residual + LayerNorm 1 ----
    ln1g = vecs[1:2, 0:H]
    ln1b = vecs[1:2, H:2 * H]
    r1 = x + attn_out
    mu1 = jnp.mean(r1, axis=-1, keepdims=True)
    var1 = jnp.mean((r1 - mu1) * (r1 - mu1), axis=-1, keepdims=True)
    y1 = (r1 - mu1) * lax.rsqrt(var1 + EPS) * ln1g + ln1b

    # ---- position-wise feed-forward ----
    wffn = wffn_ref[...]
    w1 = wffn[0:H, :]                     # (H, PF)
    w2 = wffn[H:H + PF, 0:H]              # (PF, H)
    b1 = vecs[2:3, 0:PF]
    b2 = vecs[2:3, PF:PF + H]
    h1 = jnp.dot(y1, w1, preferred_element_type=jnp.float32) + b1
    h1 = jnp.maximum(h1, 0.0)
    ff = jnp.dot(h1, w2, preferred_element_type=jnp.float32) + b2

    # ---- residual + LayerNorm 2 ----
    ln2g = vecs[1:2, 2 * H:3 * H]
    ln2b = vecs[1:2, 3 * H:4 * H]
    r2 = y1 + ff
    mu2 = jnp.mean(r2, axis=-1, keepdims=True)
    var2 = jnp.mean((r2 - mu2) * (r2 - mu2), axis=-1, keepdims=True)
    y2 = (r2 - mu2) * lax.rsqrt(var2 + EPS) * ln2g + ln2b

    out_ref[...] = y2.astype(out_ref.dtype)


# ----------------------- one-time parameter packing --------------------------
def prepare_params(p):
    """Pack all static weights into lane-dense slabs. Runs ONCE, outside jit."""
    # [wq|wk|wv] in rows 0:H, wo in rows H:2H (lane offset 0, sublane offset H)
    wqkvo = jnp.zeros((2 * H, 4 * H), jnp.float32)
    wqkvo = (wqkvo.at[0:H, 0:H].set(p["wq"])
                  .at[0:H, H:2 * H].set(p["wk"])
                  .at[0:H, 2 * H:3 * H].set(p["wv"])
                  .at[H:2 * H, 0:H].set(p["wo"]))
    # w1 on rows 0:H, w2 on rows H:H+PF (lane offset 0)
    wffn = jnp.zeros((H + PF, PF), jnp.float32)
    wffn = wffn.at[0:H, :].set(p["w1"]).at[H:H + PF, 0:H].set(p["w2"])
    # all small vectors in one (8, 128) slab
    vecs = jnp.zeros((8, 4 * H), jnp.float32)
    vecs = (vecs.at[0, 0:H].set(p["bq"][0])
                .at[0, H:2 * H].set(p["bk"][0])
                .at[0, 2 * H:3 * H].set(p["bv"][0])
                .at[0, 3 * H:4 * H].set(p["bo"][0])
                .at[1, 0:H].set(p["ln1g"][0])
                .at[1, H:2 * H].set(p["ln1b"][0])
                .at[1, 2 * H:3 * H].set(p["ln2g"][0])
                .at[1, 3 * H:4 * H].set(p["ln2b"][0])
                .at[2, 0:PF].set(p["b1"][0])
                .at[2, PF:PF + H].set(p["b2"][0]))
    return {"wqkvo": wqkvo, "wffn": wffn, "vecs": vecs}


# ------------------------------- wrapper -------------------------------------
@jax.jit
def encoder_layer(src, src_mask, prep):
    """src: [B, S, H] f32; src_mask: [B, 1, S] f32 (1 = keep, 0 = masked)."""
    x2d = src.reshape(BS, H)
    keep = src_mask.reshape(1, BS).astype(jnp.float32)

    # Single no-grid invocation: whole working set (~60 KB) lives in VMEM,
    # no per-step pipeline prologue/epilogue, no double buffering.
    out2d = pl.pallas_call(
        encoder_layer_kernel,
        out_shape=jax.ShapeDtypeStruct((BS, H), jnp.float32),
    )(x2d, keep, prep["wqkvo"], prep["wffn"], prep["vecs"])
    return out2d.reshape(B, S, H)


# ------------------------- pure-JAX reference --------------------------------
def encoder_layer_ref(src, src_mask, p):
    def ln(x, g, b):
        mu = x.mean(-1, keepdims=True)
        var = ((x - mu) ** 2).mean(-1, keepdims=True)
        return (x - mu) / jnp.sqrt(var + EPS) * g + b

    scale = math.sqrt(HD)
    q = src @ p["wq"] + p["bq"]
    k = src @ p["wk"] + p["bk"]
    v = src @ p["wv"] + p["bv"]
    q = q.reshape(B, S, NH, HD).transpose(0, 2, 1, 3)
    k = k.reshape(B, S, NH, HD).transpose(0, 2, 1, 3)
    v = v.reshape(B, S, NH, HD).transpose(0, 2, 1, 3)
    energy = jnp.einsum("bhqd,bhkd->bhqk", q, k) / scale
    m = src_mask[:, None, :, :]                      # [B,1,1,S]
    energy = jnp.where(m == 0.0, NEG_INF, energy)
    attn = jax.nn.softmax(energy, axis=-1)
    x = jnp.einsum("bhqk,bhkd->bhqd", attn, v)
    x = x.transpose(0, 2, 1, 3).reshape(B, S, H)
    x = x @ p["wo"] + p["bo"]
    y1 = ln(src + x, p["ln1g"], p["ln1b"])
    ff = jnp.maximum(y1 @ p["w1"] + p["b1"], 0.0) @ p["w2"] + p["b2"]
    return ln(y1 + ff, p["ln2g"], p["ln2b"])


# --------------------------------- main ---------------------------------------
if __name__ == "__main__":
    key = jax.random.PRNGKey(0)
    ks = jax.random.split(key, 16)

    def lin(kw, in_d, out_d):
        # weights stored [in, out] (already "transposed" relative to PyTorch)
        return (jax.random.normal(kw, (in_d, out_d), jnp.float32)
                * (1.0 / math.sqrt(in_d)))

    params = {
        "wq": lin(ks[0], H, H),  "bq": jax.random.normal(ks[1], (1, H)) * 0.02,
        "wk": lin(ks[2], H, H),  "bk": jax.random.normal(ks[3], (1, H)) * 0.02,
        "wv": lin(ks[4], H, H),  "bv": jax.random.normal(ks[5], (1, H)) * 0.02,
        "wo": lin(ks[6], H, H),  "bo": jax.random.normal(ks[7], (1, H)) * 0.02,
        "ln1g": jnp.ones((1, H), jnp.float32),
        "ln1b": jnp.zeros((1, H), jnp.float32),
        "w1": lin(ks[8], H, PF), "b1": jax.random.normal(ks[9], (1, PF)) * 0.02,
        "w2": lin(ks[10], PF, H), "b2": jax.random.normal(ks[11], (1, H)) * 0.02,
        "ln2g": jnp.ones((1, H), jnp.float32),
        "ln2b": jnp.zeros((1, H), jnp.float32),
    }

    # One-time packing of the static parameters (outside the jitted call path).
    prep = prepare_params(params)

    src = jax.random.normal(ks[12], (B, S, H), jnp.float32)
    # mask: batch 0 keeps all 8 positions, batch 1 keeps first 6
    lengths = jnp.array([8, 6], jnp.int32)
    pos = jnp.arange(S)[None, :]
    src_mask = (pos < lengths[:, None]).astype(jnp.float32)[:, None, :]  # [B,1,S]

    out = encoder_layer(src, src_mask, prep)
    out = jax.block_until_ready(out)

    ref = encoder_layer_ref(src, src_mask, params)
    # Exact softmax divide (no approx reciprocal) => tight tolerance; the
    # remaining delta is f32 rounding / op-ordering only.
    err = float(jnp.max(jnp.abs(out - ref)))
    assert jnp.allclose(out, ref, atol=1e-4, rtol=1e-4), err

    print("KERNEL_OK")
</pallas_src>

<mosaic_0001>
module attributes {stable_mosaic.version = 11 : i64} {
  func.func @encoder_layer_kernel(%arg0: memref<16x32xf32, #tpu.memory_space<vmem>>, %arg1: memref<1x16xf32, #tpu.memory_space<vmem>>, %arg2: memref<64x128xf32, #tpu.memory_space<vmem>>, %arg3: memref<96x64xf32, #tpu.memory_space<vmem>>, %arg4: memref<8x128xf32, #tpu.memory_space<vmem>>, %arg5: memref<16x32xf32, #tpu.memory_space<vmem>>) attributes {dimension_semantics = [], scalar_prefetch = 0 : i64, scratch_operands = 0 : i64, tpu.core_type = #tpu.core_type<tc>} {
    %c0 = arith.constant 0 : index
    %c0_0 = arith.constant 0 : index
    %0 = vector.load %arg0[%c0, %c0_0] : memref<16x32xf32, #tpu.memory_space<vmem>>, vector<16x32xf32>
    %c0_1 = arith.constant 0 : index
    %c0_2 = arith.constant 0 : index
    %1 = vector.load %arg4[%c0_1, %c0_2] : memref<8x128xf32, #tpu.memory_space<vmem>>, vector<8x128xf32>
    %c0_3 = arith.constant 0 : index
    %c0_4 = arith.constant 0 : index
    %2 = vector.load %arg2[%c0_3, %c0_4] : memref<64x128xf32, #tpu.memory_space<vmem>>, vector<64x128xf32>
    %3 = vector.extract_strided_slice %2 {offsets = [0, 0], sizes = [32, 128], strides = [1, 1]} : vector<64x128xf32> to vector<32x128xf32>
    %cst = arith.constant dense<0.000000e+00> : vector<16x128xf32>
    %4 = tpu.matmul %0, %3, %cst {dimension_numbers = #tpu.dot_dimension_numbers<[1], [0], [0], [1], [0, 0, 1, 1], [], []>} : vector<16x32xf32>, vector<32x128xf32>, vector<16x128xf32> -> vector<16x128xf32>
    %5 = vector.extract_strided_slice %1 {offsets = [0, 0], sizes = [1, 128], strides = [1, 1]} : vector<8x128xf32> to vector<1x128xf32>
    %6 = vector.broadcast %5 : vector<1x128xf32> to vector<16x128xf32>
    %7 = arith.addf %4, %6 : vector<16x128xf32>
    %8 = vector.extract_strided_slice %7 {offsets = [0, 0], sizes = [16, 32], strides = [1, 1]} : vector<16x128xf32> to vector<16x32xf32>
    %cst_5 = arith.constant 0.353553385 : f32
    %9 = vector.broadcast %cst_5 : f32 to vector<16x32xf32>
    %10 = arith.mulf %8, %9 : vector<16x32xf32>
    %11 = vector.extract_strided_slice %7 {offsets = [0, 32], sizes = [16, 32], strides = [1, 1]} : vector<16x128xf32> to vector<16x32xf32>
    %12 = vector.extract_strided_slice %7 {offsets = [0, 64], sizes = [16, 32], strides = [1, 1]} : vector<16x128xf32> to vector<16x32xf32>
    %13 = vector.extract_strided_slice %2 {offsets = [32, 0], sizes = [32, 32], strides = [1, 1]} : vector<64x128xf32> to vector<32x32xf32>
    %14 = vector.extract_strided_slice %1 {offsets = [0, 96], sizes = [1, 32], strides = [1, 1]} : vector<8x128xf32> to vector<1x32xf32>
    %15 = tpu.iota {dimensions = array<i32: 0>} : vector<16x16xi32>
    %16 = tpu.iota {dimensions = array<i32: 1>} : vector<16x16xi32>
    %c3_i32 = arith.constant 3 : i32
    %17 = vector.broadcast %c3_i32 : i32 to vector<16x16xi32>
    %18 = arith.shrsi %15, %17 : vector<16x16xi32>
    %c3_i32_6 = arith.constant 3 : i32
    %19 = vector.broadcast %c3_i32_6 : i32 to vector<16x16xi32>
    %20 = arith.shrsi %16, %19 : vector<16x16xi32>
    %21 = arith.cmpi eq, %18, %20 : vector<16x16xi32>
    %c0_7 = arith.constant 0 : index
    %c0_8 = arith.constant 0 : index
    %22 = vector.load %arg1[%c0_7, %c0_8] : memref<1x16xf32, #tpu.memory_space<vmem>>, vector<1x16xf32>
    %cst_9 = arith.constant 5.000000e-01 : f32
    %23 = vector.broadcast %cst_9 : f32 to vector<1x16xf32>
    %24 = arith.cmpf ogt, %22, %23 : vector<1x16xf32>
    %25 = vector.broadcast %24 : vector<1x16xi1> to vector<16x16xi1>
    %26 = arith.andi %21, %25 : vector<16x16xi1>
    %cst_10 = arith.constant 0.000000e+00 : f32
    %cst_11 = arith.constant -1.000000e+10 : f32
    %27 = vector.broadcast %cst_10 : f32 to vector<16x16xf32>
    %28 = vector.broadcast %cst_11 : f32 to vector<16x16xf32>
    %29 = arith.select %26, %27, %28 : vector<16x16xi1>, vector<16x16xf32>
    %30 = vector.extract_strided_slice %10 {offsets = [0, 0], sizes = [16, 8], strides = [1, 1]} : vector<16x32xf32> to vector<16x8xf32>
    %31 = vector.extract_strided_slice %11 {offsets = [0, 0], sizes = [16, 8], strides = [1, 1]} : vector<16x32xf32> to vector<16x8xf32>
    %32 = vector.extract_strided_slice %12 {offsets = [0, 0], sizes = [16, 8], strides = [1, 1]} : vector<16x32xf32> to vector<16x8xf32>
    %cst_12 = arith.constant dense<0.000000e+00> : vector<16x16xf32>
    %33 = tpu.matmul %30, %31, %cst_12 {dimension_numbers = #tpu.dot_dimension_numbers<[1], [1], [0], [0], [0, 0, 1, 0], [], []>} : vector<16x8xf32>, vector<16x8xf32>, vector<16x16xf32> -> vector<16x16xf32>
    %34 = arith.addf %33, %29 : vector<16x16xf32>
    %cst_13 = arith.constant dense<0xFF800000> : vector<16xf32>
    %35 = vector.multi_reduction <maximumf>, %34, %cst_13 [1] : vector<16x16xf32> to vector<16xf32>
    %36 = vector.shape_cast %35 : vector<16xf32> to vector<16x1xf32>
    %37 = vector.broadcast %36 : vector<16x1xf32> to vector<16x16xf32>
    %38 = arith.subf %34, %37 : vector<16x16xf32>
    %39 = math.exp %38 : vector<16x16xf32>
    %cst_14 = arith.constant dense<0.000000e+00> : vector<16xf32>
    %40 = vector.multi_reduction <add>, %39, %cst_14 [1] : vector<16x16xf32> to vector<16xf32>
    %41 = vector.shape_cast %40 : vector<16xf32> to vector<16x1xf32>
    %42 = vector.broadcast %41 : vector<16x1xf32> to vector<16x16xf32>
    %43 = arith.divf %39, %42 : vector<16x16xf32>
    %cst_15 = arith.constant dense<0.000000e+00> : vector<16x8xf32>
    %44 = tpu.matmul %43, %32, %cst_15 {dimension_numbers = #tpu.dot_dimension_numbers<[1], [0], [0], [1], [0, 0, 1, 1], [], []>} : vector<16x16xf32>, vector<16x8xf32>, vector<16x8xf32> -> vector<16x8xf32>
    %45 = vector.extract_strided_slice %10 {offsets = [0, 8], sizes = [16, 8], strides = [1, 1]} : vector<16x32xf32> to vector<16x8xf32>
    %46 = vector.extract_strided_slice %11 {offsets = [0, 8], sizes = [16, 8], strides = [1, 1]} : vector<16x32xf32> to vector<16x8xf32>
    %47 = vector.extract_strided_slice %12 {offsets = [0, 8], sizes = [16, 8], strides = [1, 1]} : vector<16x32xf32> to vector<16x8xf32>
    %cst_16 = arith.constant dense<0.000000e+00> : vector<16x16xf32>
    %48 = tpu.matmul %45, %46, %cst_16 {dimension_numbers = #tpu.dot_dimension_numbers<[1], [1], [0], [0], [0, 0, 1, 0], [], []>} : vector<16x8xf32>, vector<16x8xf32>, vector<16x16xf32> -> vector<16x16xf32>
    %49 = arith.addf %48, %29 : vector<16x16xf32>
    %cst_17 = arith.constant dense<0xFF800000> : vector<16xf32>
    %50 = vector.multi_reduction <maximumf>, %49, %cst_17 [1] : vector<16x16xf32> to vector<16xf32>
    %51 = vector.shape_cast %50 : vector<16xf32> to vector<16x1xf32>
    %52 = vector.broadcast %51 : vector<16x1xf32> to vector<16x16xf32>
    %53 = arith.subf %49, %52 : vector<16x16xf32>
    %54 = math.exp %53 : vector<16x16xf32>
    %cst_18 = arith.constant dense<0.000000e+00> : vector<16xf32>
    %55 = vector.multi_reduction <add>, %54, %cst_18 [1] : vector<16x16xf32> to vector<16xf32>
    %56 = vector.shape_cast %55 : vector<16xf32> to vector<16x1xf32>
    %57 = vector.broadcast %56 : vector<16x1xf32> to vector<16x16xf32>
    %58 = arith.divf %54, %57 : vector<16x16xf32>
    %cst_19 = arith.constant dense<0.000000e+00> : vector<16x8xf32>
    %59 = tpu.matmul %58, %47, %cst_19 {dimension_numbers = #tpu.dot_dimension_numbers<[1], [0], [0], [1], [0, 0, 1, 1], [], []>} : vector<16x16xf32>, vector<16x8xf32>, vector<16x8xf32> -> vector<16x8xf32>
    %60 = vector.extract_strided_slice %10 {offsets = [0, 16], sizes = [16, 8], strides = [1, 1]} : vector<16x32xf32> to vector<16x8xf32>
    %61 = vector.extract_strided_slice %11 {offsets = [0, 16], sizes = [16, 8], strides = [1, 1]} : vector<16x32xf32> to vector<16x8xf32>
    %62 = vector.extract_strided_slice %12 {offsets = [0, 16], sizes = [16, 8], strides = [1, 1]} : vector<16x32xf32> to vector<16x8xf32>
    %cst_20 = arith.constant dense<0.000000e+00> : vector<16x16xf32>
    %63 = tpu.matmul %60, %61, %cst_20 {dimension_numbers = #tpu.dot_dimension_numbers<[1], [1], [0], [0], [0, 0, 1, 0], [], []>} : vector<16x8xf32>, vector<16x8xf32>, vector<16x16xf32> -> vector<16x16xf32>
    %64 = arith.addf %63, %29 : vector<16x16xf32>
    %cst_21 = arith.constant dense<0xFF800000> : vector<16xf32>
    %65 = vector.multi_reduction <maximumf>, %64, %cst_21 [1] : vector<16x16xf32> to vector<16xf32>
    %66 = vector.shape_cast %65 : vector<16xf32> to vector<16x1xf32>
    %67 = vector.broadcast %66 : vector<16x1xf32> to vector<16x16xf32>
    %68 = arith.subf %64, %67 : vector<16x16xf32>
    %69 = math.exp %68 : vector<16x16xf32>
    %cst_22 = arith.constant dense<0.000000e+00> : vector<16xf32>
    %70 = vector.multi_reduction <add>, %69, %cst_22 [1] : vector<16x16xf32> to vector<16xf32>
    %71 = vector.shape_cast %70 : vector<16xf32> to vector<16x1xf32>
    %72 = vector.broadcast %71 : vector<16x1xf32> to vector<16x16xf32>
    %73 = arith.divf %69, %72 : vector<16x16xf32>
    %cst_23 = arith.constant dense<0.000000e+00> : vector<16x8xf32>
    %74 = tpu.matmul %73, %62, %cst_23 {dimension_numbers = #tpu.dot_dimension_numbers<[1], [0], [0], [1], [0, 0, 1, 1], [], []>} : vector<16x16xf32>, vector<16x8xf32>, vector<16x8xf32> -> vector<16x8xf32>
    %75 = vector.extract_strided_slice %10 {offsets = [0, 24], sizes = [16, 8], strides = [1, 1]} : vector<16x32xf32> to vector<16x8xf32>
    %76 = vector.extract_strided_slice %11 {offsets = [0, 24], sizes = [16, 8], strides = [1, 1]} : vector<16x32xf32> to vector<16x8xf32>
    %77 = vector.extract_strided_slice %12 {offsets = [0, 24], sizes = [16, 8], strides = [1, 1]} : vector<16x32xf32> to vector<16x8xf32>
    %cst_24 = arith.constant dense<0.000000e+00> : vector<16x16xf32>
    %78 = tpu.matmul %75, %76, %cst_24 {dimension_numbers = #tpu.dot_dimension_numbers<[1], [1], [0], [0], [0, 0, 1, 0], [], []>} : vector<16x8xf32>, vector<16x8xf32>, vector<16x16xf32> -> vector<16x16xf32>
    %79 = arith.addf %78, %29 : vector<16x16xf32>
    %cst_25 = arith.constant dense<0xFF800000> : vector<16xf32>
    %80 = vector.multi_reduction <maximumf>, %79, %cst_25 [1] : vector<16x16xf32> to vector<16xf32>
    %81 = vector.shape_cast %80 : vector<16xf32> to vector<16x1xf32>
    %82 = vector.broadcast %81 : vector<16x1xf32> to vector<16x16xf32>
    %83 = arith.subf %79, %82 : vector<16x16xf32>
    %84 = math.exp %83 : vector<16x16xf32>
    %cst_26 = arith.constant dense<0.000000e+00> : vector<16xf32>
    %85 = vector.multi_reduction <add>, %84, %cst_26 [1] : vector<16x16xf32> to vector<16xf32>
    %86 = vector.shape_cast %85 : vector<16xf32> to vector<16x1xf32>
    %87 = vector.broadcast %86 : vector<16x1xf32> to vector<16x16xf32>
    %88 = arith.divf %84, %87 : vector<16x16xf32>
    %cst_27 = arith.constant dense<0.000000e+00> : vector<16x8xf32>
    %89 = tpu.matmul %88, %77, %cst_27 {dimension_numbers = #tpu.dot_dimension_numbers<[1], [0], [0], [1], [0, 0, 1, 1], [], []>} : vector<16x16xf32>, vector<16x8xf32>, vector<16x8xf32> -> vector<16x8xf32>
    %90 = tpu.concatenate %44, %59, %74, %89 in 1 : vector<16x8xf32>, vector<16x8xf32>, vector<16x8xf32>, vector<16x8xf32> -> vector<16x32xf32>
    %cst_28 = arith.constant dense<0.000000e+00> : vector<16x32xf32>
    %91 = tpu.matmul %90, %13, %cst_28 {dimension_numbers = #tpu.dot_dimension_numbers<[1], [0], [0], [1], [0, 0, 1, 1], [], []>} : vector<16x32xf32>, vector<32x32xf32>, vector<16x32xf32> -> vector<16x32xf32>
    %92 = vector.broadcast %14 : vector<1x32xf32> to vector<16x32xf32>
    %93 = arith.addf %91, %92 : vector<16x32xf32>
    %94 = vector.extract_strided_slice %1 {offsets = [1, 0], sizes = [1, 32], strides = [1, 1]} : vector<8x128xf32> to vector<1x32xf32>
    %95 = vector.extract_strided_slice %1 {offsets = [1, 32], sizes = [1, 32], strides = [1, 1]} : vector<8x128xf32> to vector<1x32xf32>
    %96 = arith.addf %0, %93 : vector<16x32xf32>
    %cst_29 = arith.constant dense<0.000000e+00> : vector<16xf32>
    %97 = vector.multi_reduction <add>, %96, %cst_29 [1] : vector<16x32xf32> to vector<16xf32>
    %98 = vector.shape_cast %97 : vector<16xf32> to vector<16x1xf32>
    %cst_30 = arith.constant 3.200000e+01 : f32
    %99 = vector.broadcast %cst_30 : f32 to vector<16x1xf32>
    %100 = arith.divf %98, %99 : vector<16x1xf32>
    %101 = vector.broadcast %100 : vector<16x1xf32> to vector<16x32xf32>
    %102 = arith.subf %96, %101 : vector<16x32xf32>
    %103 = vector.broadcast %100 : vector<16x1xf32> to vector<16x32xf32>
    %104 = arith.subf %96, %103 : vector<16x32xf32>
    %105 = arith.mulf %102, %104 : vector<16x32xf32>
    %cst_31 = arith.constant dense<0.000000e+00> : vector<16xf32>
    %106 = vector.multi_reduction <add>, %105, %cst_31 [1] : vector<16x32xf32> to vector<16xf32>
    %107 = vector.shape_cast %106 : vector<16xf32> to vector<16x1xf32>
    %cst_32 = arith.constant 3.200000e+01 : f32
    %108 = vector.broadcast %cst_32 : f32 to vector<16x1xf32>
    %109 = arith.divf %107, %108 : vector<16x1xf32>
    %110 = vector.broadcast %100 : vector<16x1xf32> to vector<16x32xf32>
    %111 = arith.subf %96, %110 : vector<16x32xf32>
    %cst_33 = arith.constant 9.99999974E-6 : f32
    %112 = vector.broadcast %cst_33 : f32 to vector<16x1xf32>
    %113 = arith.addf %109, %112 : vector<16x1xf32>
    %114 = math.rsqrt %113 : vector<16x1xf32>
    %115 = vector.broadcast %114 : vector<16x1xf32> to vector<16x32xf32>
    %116 = arith.mulf %111, %115 : vector<16x32xf32>
    %117 = vector.broadcast %94 : vector<1x32xf32> to vector<16x32xf32>
    %118 = arith.mulf %116, %117 : vector<16x32xf32>
    %119 = vector.broadcast %95 : vector<1x32xf32> to vector<16x32xf32>
    %120 = arith.addf %118, %119 : vector<16x32xf32>
    %c0_34 = arith.constant 0 : index
    %c0_35 = arith.constant 0 : index
    %121 = vector.load %arg3[%c0_34, %c0_35] : memref<96x64xf32, #tpu.memory_space<vmem>>, vector<96x64xf32>
    %122 = vector.extract_strided_slice %121 {offsets = [0, 0], sizes = [32, 64], strides = [1, 1]} : vector<96x64xf32> to vector<32x64xf32>
    %123 = vector.extract_strided_slice %121 {offsets = [32, 0], sizes = [64, 32], strides = [1, 1]} : vector<96x64xf32> to vector<64x32xf32>
    %124 = vector.extract_strided_slice %1 {offsets = [2, 0], sizes = [1, 64], strides = [1, 1]} : vector<8x128xf32> to vector<1x64xf32>
    %125 = vector.extract_strided_slice %1 {offsets = [2, 64], sizes = [1, 32], strides = [1, 1]} : vector<8x128xf32> to vector<1x32xf32>
    %cst_36 = arith.constant dense<0.000000e+00> : vector<16x64xf32>
    %126 = tpu.matmul %120, %122, %cst_36 {dimension_numbers = #tpu.dot_dimension_numbers<[1], [0], [0], [1], [0, 0, 1, 1], [], []>} : vector<16x32xf32>, vector<32x64xf32>, vector<16x64xf32> -> vector<16x64xf32>
    %127 = vector.broadcast %124 : vector<1x64xf32> to vector<16x64xf32>
    %128 = arith.addf %126, %127 : vector<16x64xf32>
    %cst_37 = arith.constant 0.000000e+00 : f32
    %129 = vector.broadcast %cst_37 : f32 to vector<16x64xf32>
    %130 = arith.maximumf %128, %129 : vector<16x64xf32>
    %cst_38 = arith.constant dense<0.000000e+00> : vector<16x32xf32>
    %131 = tpu.matmul %130, %123, %cst_38 {dimension_numbers = #tpu.dot_dimension_numbers<[1], [0], [0], [1], [0, 0, 1, 1], [], []>} : vector<16x64xf32>, vector<64x32xf32>, vector<16x32xf32> -> vector<16x32xf32>
    %132 = vector.broadcast %125 : vector<1x32xf32> to vector<16x32xf32>
    %133 = arith.addf %131, %132 : vector<16x32xf32>
    %134 = vector.extract_strided_slice %1 {offsets = [1, 64], sizes = [1, 32], strides = [1, 1]} : vector<8x128xf32> to vector<1x32xf32>
    %135 = vector.extract_strided_slice %1 {offsets = [1, 96], sizes = [1, 32], strides = [1, 1]} : vector<8x128xf32> to vector<1x32xf32>
    %136 = arith.addf %120, %133 : vector<16x32xf32>
    %cst_39 = arith.constant dense<0.000000e+00> : vector<16xf32>
    %137 = vector.multi_reduction <add>, %136, %cst_39 [1] : vector<16x32xf32> to vector<16xf32>
    %138 = vector.shape_cast %137 : vector<16xf32> to vector<16x1xf32>
    %cst_40 = arith.constant 3.200000e+01 : f32
    %139 = vector.broadcast %cst_40 : f32 to vector<16x1xf32>
    %140 = arith.divf %138, %139 : vector<16x1xf32>
    %141 = vector.broadcast %140 : vector<16x1xf32> to vector<16x32xf32>
    %142 = arith.subf %136, %141 : vector<16x32xf32>
    %143 = vector.broadcast %140 : vector<16x1xf32> to vector<16x32xf32>
    %144 = arith.subf %136, %143 : vector<16x32xf32>
    %145 = arith.mulf %142, %144 : vector<16x32xf32>
    %cst_41 = arith.constant dense<0.000000e+00> : vector<16xf32>
    %146 = vector.multi_reduction <add>, %145, %cst_41 [1] : vector<16x32xf32> to vector<16xf32>
    %147 = vector.shape_cast %146 : vector<16xf32> to vector<16x1xf32>
    %cst_42 = arith.constant 3.200000e+01 : f32
    %148 = vector.broadcast %cst_42 : f32 to vector<16x1xf32>
    %149 = arith.divf %147, %148 : vector<16x1xf32>
    %150 = vector.broadcast %140 : vector<16x1xf32> to vector<16x32xf32>
    %151 = arith.subf %136, %150 : vector<16x32xf32>
    %cst_43 = arith.constant 9.99999974E-6 : f32
    %152 = vector.broadcast %cst_43 : f32 to vector<16x1xf32>
    %153 = arith.addf %149, %152 : vector<16x1xf32>
    %154 = math.rsqrt %153 : vector<16x1xf32>
    %155 = vector.broadcast %154 : vector<16x1xf32> to vector<16x32xf32>
    %156 = arith.mulf %151, %155 : vector<16x32xf32>
    %157 = vector.broadcast %134 : vector<1x32xf32> to vector<16x32xf32>
    %158 = arith.mulf %156, %157 : vector<16x32xf32>
    %159 = vector.broadcast %135 : vector<1x32xf32> to vector<16x32xf32>
    %160 = arith.addf %158, %159 : vector<16x32xf32>
    %c0_44 = arith.constant 0 : index
    %c0_45 = arith.constant 0 : index
    %161 = vector.load %arg5[%c0_44, %c0_45] : memref<16x32xf32, #tpu.memory_space<vmem>>, vector<16x32xf32>
    tpu.vector_store %arg5[%c0_44, %c0_45], %160 {strides = array<i32>} : memref<16x32xf32, #tpu.memory_space<vmem>>, vector<16x32xf32>,
    return
  }
}

</mosaic_0001>

<bundles_post_ra>
// kernel: encoder_layer.1
= control target key start
LH: loop header
LB: loop body
LE: loop exit
PB: predicated region body
PF: predicated region fallthrough
CT: control target
= control target key end

     0   :  { %s1287_s0 = inlined_call_operand.vmem [shape: f32[16,32], index: 0, kind: input, shape index: {}]   ;;  %s1288_s1 = inlined_call_operand.vmem [shape: f32[1,16], index: 1, kind: input, shape index: {}]   ;;  %s1289_s2 = inlined_call_operand.vmem [shape: f32[64,128], index: 2, kind: input, shape index: {}]   ;;  %s1290_s3 = inlined_call_operand.vmem [shape: f32[96,64], index: 3, kind: input, shape index: {}]   ;;  %s1291_s4 = inlined_call_operand.vmem [shape: f32[8,128], index: 4, kind: input, shape index: {}]   ;;  %s1292_s5 = inlined_call_operand.hbm [shape: f32[16,32], index: 5, kind: output, shape index: {}]  }
   0x1   :  { %v27_v0 = vld [vmem:[%s1289_s2 + $0x18] sm:$0xff]  ;;  %v26_v1 = vld [vmem:[%s1289_s2 + $0x10] sm:$0xff]  ;;  %v25_v2 = vld [vmem:[%s1289_s2 + $0x8] sm:$0xff] }
   0x2   :  { %52 = vmatpush.msra.mxu0 %v27_v0 }
   0x3   :  { %10 = vsyncpa [#allocation3], 0  ;;  %v24_v3 = vld [vmem:[%s1289_s2] sm:$0xff]  ;;  %vm33_vm0 = vcmask 261120   ;;  %v1066_v5 = vld [vmem:[%s1287_s0 + $0x8] sm:$0xff]  ;;  %s994_s7 = smov 120   ;;  %v65_v30 = vlaneseq }
   0x4   :  { %53 = vmatpush.msra.mxu0 %v26_v1  ;;  %v1059_v4 = vld [vmem:[%s1287_s0] sm:$0xff]  ;;  %s995_s0 = smov 88   ;;  %s996_s8 = smov 96   ;;  %vm90_vm1 = vcmask 64512   ;;  %v1001_v33 = vmov 0   ;;  %vm124_vm6 = vcmask 130048  }
   0x5   :  { %v1073_v6 = vld [vmem:[%s1291_s4] sm:$0xff]  ;;  %s997_s4 = smov 104   ;;  %s998_s9 = smov 72   ;;  %v66_v31 = vshrl.u32 %v65_v30, 7  ;;  %v69_v32 = vand.u32 127, %v65_v30 }
   0x6   :  { %54 = vmatpush.msra.mxu0 %v25_v2  ;;  %v1076_v7 = vperm.slane %v1073_v6, 0  ;;  %s999_s10 = smov 80   ;;  %s1000_s11 = smov 112   ;;  %v75_v29 = vld [vmem:[%s1288_s1] sm:$0x1] }
   0x7   :  { %vm76_vm2 = vcmp.gt.f32.partialorder %v75_v29, 0.5  ;;  %v70_v35 = vshra.s32 %v66_v31, 3  ;;  %v72_v36 = vshra.s32 %v69_v32, 3  ;;  %v67_v38 = vadd.s32 8, %v66_v31  ;;  %s1003_s1 = smov 56   ;;  %s1004_s14 = smov 64  }
   0x8   :  { %55 = vmatpush.msra.mxu0 %v24_v3  ;;  %v77_v34 = vsel %vm76_vm2, 1, %v1001_v33  ;;  %v1002_v40 = vmov -1e+10   ;;  %s1005_s15 = smov 48   ;;  %s1006_s16 = smov 40  }
   0x9   :  { %854 = vmatmul.msk.f32.vlgmr.msra.gmra.mxu0 %vm33_vm0, %v1059_v4  ;;  %v78_v37 = vperm.slane %v77_v34, 0  ;;  %vm73_vm3 = vcmp.eq.s32.totalorder %v70_v35, %v72_v36  ;;  %v71_v39 = vshra.s32 %v67_v38, 3  ;;  %s1007_s17 = smov 16   ;;  %s1008_s18 = smov 24  }
   0xa   :  { %s1009_s19 = smov 8   ;;  %s1010_s20 = smov 32  }
   0xb   :  { %vm79_vm4 = vcmp.eq.s32.totalorder %v78_v37, 1  ;;  %vm74_vm7 = vcmp.eq.s32.totalorder %v71_v39, %v72_v36  ;;  %s842_s26 = sshll.u32 %s1292_s5, 4  ;;  %s1012_s27 = smov [#allocation2]   ;;  %s843_s26 = int_to_ptr.hbm [resolvable:$true] %s842_s26 }
   0xc   :  { %vm80_vm5 = vmand %vm73_vm3, %vm79_vm4  ;;  %s840_s28 = sshll.u32 %s1012_s27, 4  ;;  %s841_s28 = int_to_ptr.vmem [resolvable:$true] %s840_s28 }
   0xd   :  { %v82_v41 = vsel %vm80_vm5, 0.0, %v1002_v40  ;;  %vm81_vm8 = vmand %vm74_vm7, %vm79_vm4 }
   0xe   :  { %v83_v46 = vsel %vm81_vm8, 0.0, %v1002_v40 }
  0x11   :  { %855 = vmatmul.msk.f32.gmra.mxu0 %vm33_vm0, %v1066_v5 }
  0x86   :  { %v57_v8 = vpop.f32.mrf.mxu0 }
  0x87   :  { %v58_v9 = vadd.f32 %v57_v8, %v1076_v7 }
  0x89   :  { %v63_v10 = vmul.f32 0.35355338, %v58_v9 }
  0x8b   :  { %208 = vrot.lane.b32.xlu2 %v63_v10, %s994_s7 }
  0x8e   :  { %v60_v11 = vpop.f32.mrf.mxu0 }
  0x8f   :  { %v61_v12 = vadd.f32 %v60_v11, %v1076_v7 }
  0x91   :  { %214 = vrot.lane.b32.xlu1 %v61_v12, %s995_s0  ;;  %88 = vrot.lane.b32.xlu0 %v61_v12, %s996_s8  ;;  %v64_v13 = vmul.f32 0.35355338, %v61_v12  ;;  %v1081_v14 = vpack.i.bf16 %v58_v9, %v61_v12 }
  0x93   :  { %210 = vrot.lane.b32.xlu2 %v64_v13, %s994_s7 }
  0x99   :  { %212 = vrot.lane.b32.xlu1 %v58_v9, %s995_s0  ;;  %86 = vrot.lane.b32.xlu0 %v58_v9, %s996_s8 }
  0x9b   :  { %452 = vrot.lane.b32.xlu2 %v63_v10, %s997_s4 }
  0xa1   :  { %456 = vrot.lane.b32.xlu1 %v58_v9, %s998_s9  ;;  %458 = vrot.lane.b32.xlu0 %v61_v12, %s998_s9 }
  0xa3   :  { %454 = vrot.lane.b32.xlu2 %v64_v13, %s997_s4 }
  0xa9   :  { %334 = vrot.lane.b32.xlu1 %v58_v9, %s999_s10  ;;  %336 = vrot.lane.b32.xlu0 %v61_v12, %s999_s10 }
  0xb1   :  { %332 = vrot.lane.b32.xlu1 %v64_v13, %s1000_s11  ;;  %330 = vrot.lane.b32.xlu0 %v63_v10, %s1000_s11 }
  0xe5   :  { %v209_v17 = vpop.permute.xlu2 %208 }
  0xed   :  { %v211_v20 = vpop.permute.xlu2 %210 }
  0xf5   :  { %v453_v24 = vpop.permute.xlu2 %452 }
  0xfd   :  { %v455_v27 = vpop.permute.xlu2 %454 }
 0x103   :  { %v215_v15 = vpop.permute.xlu1 %214  ;;  %v89_v16 = vpop.permute.xlu0 %88 }
 0x104   :  { %856 = vmatpush.xpose.msk.msra.mxu1 %vm90_vm1, %v89_v16  ;;  %862 = vmatpush.xpose.msk.msra.mxu3 %vm90_vm1, %v215_v15 }
 0x10b   :  { %v213_v18 = vpop.permute.xlu1 %212  ;;  %v87_v19 = vpop.permute.xlu0 %86 }
 0x10c   :  { %857 = vmatpush.xpose.msk.msra.mxu1 %vm90_vm1, %v87_v19  ;;  %863 = vmatpush.xpose.msk.msra.mxu3 %vm90_vm1, %v213_v18 }
 0x10f   :  { %858 = vmatmul.msk.f32.vlgmr.msra.gmra.mxu1 %vm90_vm1, %v63_v10  ;;  %864 = vmatmul.msk.f32.vlgmr.msra.gmra.mxu3 %vm90_vm1, %v209_v17 }
 0x113   :  { %v459_v21 = vpop.permute.xlu0 %458  ;;  %v457_v22 = vpop.permute.xlu1 %456 }
 0x114   :  { %874 = vmatpush.xpose.msk.msrb.mxu3 %vm90_vm1, %v459_v21 }
 0x117   :  { %859 = vmatmul.msk.f32.gmra.mxu1 %vm90_vm1, %v64_v13  ;;  %865 = vmatmul.msk.f32.gmra.mxu3 %vm90_vm1, %v211_v20 }
 0x118   :  { %875 = vmatpush.xpose.msk.msrb.mxu3 %vm90_vm1, %v457_v22 }
 0x11b   :  { %v337_v23 = vpop.permute.xlu0 %336  ;;  %v335_v25 = vpop.permute.xlu1 %334 }
 0x11c   :  { %868 = vmatpush.xpose.msk.msrb.mxu0 %vm90_vm1, %v337_v23 }
 0x11f   :  { %876 = vmatmul.msk.f32.vlgmr.msrb.gmra.mxu3 %vm90_vm1, %v453_v24 }
 0x120   :  { %869 = vmatpush.xpose.msk.msrb.mxu0 %vm90_vm1, %v335_v25 }
 0x123   :  { %v331_v26 = vpop.permute.xlu0 %330  ;;  %v333_v28 = vpop.permute.xlu1 %332 }
 0x124   :  { %870 = vmatmul.msk.f32.vlgmr.msrb.gmra.mxu0 %vm90_vm1, %v331_v26 }
 0x127   :  { %877 = vmatmul.msk.f32.gmra.mxu3 %vm90_vm1, %v455_v27 }
 0x12c   :  { %871 = vmatmul.msk.f32.gmra.mxu0 %vm90_vm1, %v333_v28 }
 0x18c   :  { %v118_v42 = vpop.f32.mrf.mxu1 }
 0x18d   :  { %v119_v43 = vadd.f32 %v118_v42, %v82_v41 }
 0x18f   :  { %v125_v44 = vsel %vm124_vm6, %v119_v43, -inf }
 0x190   :  { %126 = vmax.xlane.f32.xlu2 %v125_v44 }
 0x192   :  { %v241_v45 = vpop.f32.mrf.mxu3 }
 0x193   :  { %v242_v47 = vadd.f32 %v241_v45, %v82_v41 }
 0x194   :  { %v121_v48 = vpop.f32.mrf.mxu1 }
 0x195   :  { %v122_v49 = vadd.f32 %v121_v48, %v83_v46  ;;  %v247_v50 = vsel %vm124_vm6, %v242_v47, -inf }
 0x196   :  { %248 = vmax.xlane.f32.xlu1 %v247_v50 }
 0x197   :  { %v128_v51 = vsel %vm124_vm6, %v122_v49, -inf }
 0x198   :  { %129 = vmax.xlane.f32.xlu0 %v128_v51 }
 0x19a   :  { %v244_v52 = vpop.f32.mrf.mxu3 }
 0x19b   :  { %v245_v63 = vadd.f32 %v244_v52, %v83_v46 }
 0x19d   :  { %v250_v0 = vsel %vm124_vm6, %v245_v63, -inf }
 0x1a1   :  { %v363_v53 = vpop.f32.mrf.mxu0 }
 0x1a2   :  { %v364_v54 = vadd.f32 %v363_v53, %v82_v41  ;;  %v485_v55 = vpop.f32.mrf.mxu3 }
 0x1a3   :  { %v486_v1 = vadd.f32 %v485_v55, %v82_v41 }
 0x1a4   :  { %v369_v56 = vsel %vm124_vm6, %v364_v54, -inf }
 0x1a5   :  { %370 = vmax.xlane.f32.xlu0 %v369_v56  ;;  %v491_v2 = vsel %vm124_vm6, %v486_v1, -inf }
 0x1a9   :  { %v366_v57 = vpop.f32.mrf.mxu0 }
 0x1aa   :  { %v367_v58 = vadd.f32 %v366_v57, %v83_v46  ;;  %v488_v59 = vpop.f32.mrf.mxu3 }
 0x1ab   :  { %v1107_v60 = vadd.f32 %v488_v59, %v83_v46 }
 0x1ac   :  { %v372_v61 = vsel %vm124_vm6, %v367_v58, -inf }
 0x1ad   :  { %373 = vmax.xlane.f32.xlu2 %v372_v61  ;;  %v494_v62 = vsel %vm124_vm6, %v1107_v60, -inf }
 0x1ae   :  { %495 = vmax.xlane.f32.xlu1 %v494_v62 }
 0x1b5   :  { %251 = vmax.xlane.f32.xlu2 %v250_v0 }
 0x1bd   :  { %492 = vmax.xlane.f32.xlu2 %v491_v2 }
 0x1c7   :  { %912 = vrot.lane.b32.xlu1 %v1081_v14, %s1003_s1 }
 0x203   :  { %v127_v3 = vpop.xlane.xlu2 %126 }
 0x204   :  { %v131_v8 = vsub.f32 %v119_v43, %v127_v3 }
 0x206   :  { %v133_v9 = vmul.f32 1.442695, %v131_v8 }
 0x208   :  { %926 = vpow2.f32 %v133_v9 }
 0x209   :  { %v249_v18 = vpop.xlane.xlu1 %248 }
 0x20a   :  { %v253_v21 = vsub.f32 %v242_v47, %v249_v18 }
 0x20b   :  { %v130_v10 = vpop.xlane.xlu0 %129 }
 0x20c   :  { %v132_v11 = vsub.f32 %v122_v49, %v130_v10  ;;  %v255_v23 = vmul.f32 1.442695, %v253_v21 }
 0x20e   :  { %v1115_v12 = vpop.eup %926  ;;  %v135_v13 = vmul.f32 1.442695, %v132_v11 }
 0x20f   :  { %v137_v15 = vsel %vm124_vm6, %v1115_v12, 0.0 }
 0x210   :  { %928 = vpow2.f32 %v135_v13  ;;  %138 = vadd.xlane.f32.xlu0 %v137_v15 }
 0x216   :  { %v1119_v16 = vpop.eup %928 }
 0x217   :  { %v140_v17 = vsel %vm124_vm6, %v1119_v16, 0.0 }
 0x218   :  { %141 = vadd.xlane.f32.xlu1 %v140_v17  ;;  %v371_v19 = vpop.xlane.xlu0 %370 }
 0x219   :  { %v375_v20 = vsub.f32 %v364_v54, %v371_v19 }
 0x21b   :  { %v377_v22 = vmul.f32 1.442695, %v375_v20 }
 0x21d   :  { %930 = vpow2.f32 %v377_v22 }
 0x21e   :  { %932 = vpow2.f32 %v255_v23 }
 0x220   :  { %v374_v24 = vpop.xlane.xlu2 %373 }
 0x221   :  { %v376_v35 = vsub.f32 %v367_v58, %v374_v24  ;;  %v496_v39 = vpop.xlane.xlu1 %495 }
 0x222   :  { %v498_v41 = vsub.f32 %v1107_v60, %v496_v39 }
 0x223   :  { %v1123_v25 = vpop.eup %930  ;;  %v379_v38 = vmul.f32 1.442695, %v376_v35 }
 0x224   :  { %907 = vrot.lane.b32.xlu0 %v1081_v14, %s1004_s14  ;;  %v381_v26 = vsel %vm124_vm6, %v1123_v25, 0.0  ;;  %v1129_v28 = vpop.eup %932  ;;  %v501_v43 = vmul.f32 1.442695, %v498_v41 }
 0x225   :  { %382 = vadd.xlane.f32.xlu2 %v381_v26  ;;  %v259_v31 = vsel %vm124_vm6, %v1129_v28, 0.0 }
 0x228   :  { %v252_v27 = vpop.xlane.xlu2 %251 }
 0x229   :  { %v254_v29 = vsub.f32 %v245_v63, %v252_v27 }
 0x22b   :  { %v257_v30 = vmul.f32 1.442695, %v254_v29 }
 0x22d   :  { %934 = vpow2.f32 %v257_v30  ;;  %260 = vadd.xlane.f32.xlu2 %v259_v31 }
 0x230   :  { %v493_v32 = vpop.xlane.xlu2 %492 }
 0x231   :  { %v497_v33 = vsub.f32 %v486_v1, %v493_v32 }
 0x233   :  { %v1133_v34 = vpop.eup %934  ;;  %v499_v36 = vmul.f32 1.442695, %v497_v33 }
 0x234   :  { %v262_v37 = vsel %vm124_vm6, %v1133_v34, 0.0 }
 0x235   :  { %936 = vpow2.f32 %v499_v36  ;;  %263 = vadd.xlane.f32.xlu1 %v262_v37 }
 0x236   :  { %938 = vpow2.f32 %v379_v38 }
 0x237   :  { %940 = vpow2.f32 %v501_v43 }
 0x239   :  { %v913_v48 = vpop.permute.xlu1 %912 }
 0x23a   :  { %v914_v13 = vunpack.i.l.bf16 %v913_v48  ;;  %v915_v18 = vunpack.i.h.bf16 %v913_v48 }
 0x23b   :  { %v1137_v40 = vpop.eup %936 }
 0x23c   :  { %v503_v42 = vsel %vm124_vm6, %v1137_v40, 0.0  ;;  %v1142_v44 = vpop.eup %938 }
 0x23d   :  { %504 = vadd.xlane.f32.xlu2 %v503_v42  ;;  %v384_v45 = vsel %vm124_vm6, %v1142_v44, 0.0  ;;  %v1146_v46 = vpop.eup %940 }
 0x23e   :  { %v506_v47 = vsel %vm124_vm6, %v1146_v46, 0.0 }
 0x245   :  { %385 = vadd.xlane.f32.xlu2 %v384_v45 }
 0x24e   :  { %507 = vadd.xlane.f32.xlu0 %v506_v47  ;;  %922 = vrot.lane.b32.xlu1 %v1081_v14, %s1005_s15 }
 0x25d   :  { %917 = vrot.lane.b32.xlu2 %v1081_v14, %s1006_s16 }
 0x283   :  { %v139_v49 = vpop.xlane.xlu0 %138 }
 0x284   :  { %942 = vrcp.f32 %v139_v49  ;;  %v154_v55 = vand.u32 2147483648, %v139_v49  ;;  %vm148_vm10 = vweird.f32 %v139_v49  ;;  %v152_v58 = vand.u32 2147483647, %v139_v49 }
 0x286   :  { %v155_v61 = vor.u32 1.1754944e-38, %v154_v55  ;;  %vm153_vm12 = vcmp.eq.f32.partialorder %v152_v58, 8.507059e+37 }
 0x28a   :  { %v943_v50 = vpop.eup %942 }
 0x28b   :  { %v144_v51 = vmul.f32 %v943_v50, %v139_v49  ;;  %v142_v52 = vpop.xlane.xlu1 %141  ;;  %vm149_vm9 = vweird.f32 %v943_v50 }
 0x28c   :  { %944 = vrcp.f32 %v142_v52  ;;  %vm150_vm11 = vmor %vm148_vm10, %vm149_vm9  ;;  %v169_v3 = vand.u32 2147483648, %v142_v52  ;;  %vm163_vm14 = vweird.f32 %v142_v52  ;;  %v167_v11 = vand.u32 2147483647, %v142_v52 }
 0x28d   :  { %v145_v53 = vsub.f32 1.0, %v144_v51 }
 0x28e   :  { %v170_v17 = vor.u32 1.1754944e-38, %v169_v3  ;;  %vm168_vm2 = vcmp.eq.f32.partialorder %v167_v11, 8.507059e+37 }
 0x28f   :  { %v146_v54 = vmul.f32 %v943_v50, %v145_v53 }
 0x291   :  { %v147_v56 = vadd.f32 %v943_v50, %v146_v54 }
 0x292   :  { %v945_v57 = vpop.eup %944 }
 0x293   :  { %v159_v59 = vmul.f32 %v945_v57, %v142_v52  ;;  %v151_v60 = vsel %vm150_vm11, %v943_v50, %v147_v56  ;;  %vm164_vm13 = vweird.f32 %v945_v57 }
 0x294   :  { %v156_v1 = vsel %vm153_vm12, %v155_v61, %v151_v60  ;;  %vm165_vm15 = vmor %vm163_vm14, %vm164_vm13 }
 0x295   :  { %v160_v14 = vsub.f32 1.0, %v159_v59  ;;  %v157_v9 = vmul.f32 %v1115_v12, %v156_v1 }
 0x296   :  { %v908_v62 = vpop.permute.xlu0 %907 }
 0x297   :  { %v161_v63 = vmul.f32 %v945_v57, %v160_v14  ;;  %v909_v0 = vunpack.i.l.bf16 %v908_v62  ;;  %v910_v8 = vunpack.i.h.bf16 %v908_v62 }
 0x298   :  { %v1152_v2 = vpop.xlane.xlu2 %382 }
 0x299   :  { %199 = vmatpush.msra.mxu2 %v909_v0  ;;  %v162_v10 = vadd.f32 %v945_v57, %v161_v63  ;;  %v398_v56 = vand.u32 2147483648, %v1152_v2  ;;  %vm392_vm13 = vweird.f32 %v1152_v2  ;;  %v396_v59 = vand.u32 2147483647, %v1152_v2 }
 0x29b   :  { %200 = vmatpush.msra.mxu2 %v910_v8  ;;  %v166_v15 = vsel %vm165_vm15, %v945_v57, %v162_v10  ;;  %v399_v0 = vor.u32 1.1754944e-38, %v398_v56 }
 0x29c   :  { %860 = vmatmul.msk.f32.vlgmr.msra.gmra.mxu2 %vm124_vm6, %v157_v9  ;;  %v171_v19 = vsel %vm168_vm2, %v170_v17, %v166_v15 }
 0x29d   :  { %321 = vmatpush.msrb.mxu2 %v914_v13  ;;  %v172_v21 = vmul.f32 %v1119_v16, %v171_v19 }
 0x29f   :  { %322 = vmatpush.msrb.mxu2 %v915_v18 }
 0x2a0   :  { %v261_v20 = vpop.xlane.xlu2 %260 }
 0x2a1   :  { %946 = vrcp.f32 %v261_v20  ;;  %v276_v29 = vand.u32 2147483648, %v261_v20  ;;  %v274_v31 = vand.u32 2147483647, %v261_v20  ;;  %vm270_vm4 = vweird.f32 %v261_v20 }
 0x2a2   :  { %948 = vrcp.f32 %v1152_v2 }
 0x2a3   :  { %v277_v33 = vor.u32 1.1754944e-38, %v276_v29  ;;  %vm275_vm7 = vcmp.eq.f32.partialorder %v274_v31, 8.507059e+37 }
 0x2a4   :  { %861 = vmatmul.msk.f32.gmra.mxu2 %vm124_vm6, %v172_v21 }
 0x2a7   :  { %v947_v12 = vpop.eup %946 }
 0x2a8   :  { %v266_v22 = vmul.f32 %v947_v12, %v261_v20  ;;  %v264_v23 = vpop.xlane.xlu1 %263  ;;  %v1159_v24 = vpop.eup %948  ;;  %vm271_vm3 = vweird.f32 %v947_v12 }
 0x2a9   :  { %950 = vrcp.f32 %v264_v23  ;;  %v388_v30 = vmul.f32 %v1159_v24, %v1152_v2  ;;  %vm272_vm5 = vmor %vm270_vm4, %vm271_vm3  ;;  %v291_v42 = vand.u32 2147483648, %v264_v23  ;;  %v289_v47 = vand.u32 2147483647, %v264_v23 }
 0x2aa   :  { %v267_v26 = vsub.f32 1.0, %v266_v22  ;;  %vm285_vm9 = vweird.f32 %v264_v23  ;;  %vm393_vm12 = vweird.f32 %v1159_v24  ;;  %vm397_vm3 = vcmp.eq.f32.partialorder %v396_v59, 8.507059e+37 }
 0x2ab   :  { %v389_v38 = vsub.f32 1.0, %v388_v30  ;;  %v292_v51 = vor.u32 1.1754944e-38, %v291_v42  ;;  %vm290_vm11 = vcmp.eq.f32.partialorder %v289_v47, 8.507059e+37  ;;  %vm1172_vm14 = vmor %vm392_vm13, %vm393_vm12 }
 0x2ac   :  { %v268_v27 = vmul.f32 %v947_v12, %v267_v26 }
 0x2ad   :  { %v390_v48 = vmul.f32 %v1159_v24, %v389_v38 }
 0x2ae   :  { %v269_v32 = vadd.f32 %v947_v12, %v268_v27 }
 0x2af   :  { %v951_v16 = vpop.eup %950  ;;  %v391_v55 = vadd.f32 %v1159_v24, %v390_v48 }
 0x2b0   :  { %v281_v35 = vmul.f32 %v951_v16, %v264_v23  ;;  %v505_v36 = vpop.xlane.xlu2 %504  ;;  %v273_v37 = vsel %vm272_vm5, %v947_v12, %v269_v32  ;;  %vm286_vm8 = vweird.f32 %v951_v16 }
 0x2b1   :  { %952 = vrcp.f32 %v505_v36  ;;  %v278_v41 = vsel %vm275_vm7, %v277_v33, %v273_v37  ;;  %vm287_vm10 = vmor %vm285_vm9, %vm286_vm8  ;;  %v520_v60 = vand.u32 2147483648, %v505_v36  ;;  %v518_v62 = vand.u32 2147483647, %v505_v36 }
 0x2b2   :  { %v282_v39 = vsub.f32 1.0, %v281_v35  ;;  %v279_v43 = vmul.f32 %v1129_v28, %v278_v41  ;;  %v395_v63 = vsel %vm1172_vm14, %v1159_v24, %v391_v55  ;;  %vm514_vm2 = vweird.f32 %v505_v36 }
 0x2b3   :  { %v521_v2 = vor.u32 1.1754944e-38, %v520_v60  ;;  %vm519_vm5 = vcmp.eq.f32.partialorder %v518_v62, 8.507059e+37  ;;  %v400_v11 = vsel %vm397_vm3, %v399_v0, %v395_v63 }
 0x2b4   :  { %v283_v45 = vmul.f32 %v951_v16, %v282_v39  ;;  %866 = vmatmul.msk.f32.vlgmr.msrb.gmra.mxu2 %vm124_vm6, %v279_v43  ;;  %v401_v22 = vmul.f32 %v1123_v25, %v400_v11 }
 0x2b6   :  { %v284_v49 = vadd.f32 %v951_v16, %v283_v45 }
 0x2b7   :  { %v953_v50 = vpop.eup %952 }
 0x2b8   :  { %v510_v52 = vmul.f32 %v953_v50, %v505_v36  ;;  %v386_v53 = vpop.xlane.xlu2 %385  ;;  %v288_v54 = vsel %vm287_vm10, %v951_v16, %v284_v49  ;;  %vm515_vm15 = vweird.f32 %v953_v50 }
 0x2b9   :  { %954 = vrcp.f32 %v386_v53  ;;  %v293_v28 = vsel %vm290_vm11, %v292_v51, %v288_v54  ;;  %vm516_vm4 = vmor %vm514_vm2, %vm515_vm15  ;;  %v413_v20 = vand.u32 2147483648, %v386_v53  ;;  %v411_v26 = vand.u32 2147483647, %v386_v53  ;;  %v31_v51 = vld [vmem:[%s1289_s2 + $0x38] sm:$0xff]  ;;  %v28_v54 = vld [vmem:[%s1289_s2 + $0x20] sm:$0xff] }
 0x2ba   :  { %v511_v57 = vsub.f32 1.0, %v510_v52  ;;  %v294_v58 = vmul.f32 %v1133_v34, %v293_v28  ;;  %vm407_vm8 = vweird.f32 %v386_v53  ;;  %v30_v52 = vld [vmem:[%s1289_s2 + $0x30] sm:$0xff]  ;;  %627 = vmatpush.msra.mxu0 %v31_v51  ;;  %vm602_vm15 = vcmask 195584  }
 0x2bb   :  { %v414_v29 = vor.u32 1.1754944e-38, %v413_v20  ;;  %vm412_vm10 = vcmp.eq.f32.partialorder %v411_v26, 8.507059e+37 }
 0x2bc   :  { %v512_v14 = vmul.f32 %v953_v50, %v511_v57  ;;  %867 = vmatmul.msk.f32.gmra.mxu2 %vm124_vm6, %v294_v58  ;;  %628 = vmatpush.msra.mxu0 %v30_v52 }
 0x2be   :  { %v513_v34 = vadd.f32 %v953_v50, %v512_v14 }
 0x2bf   :  { %v955_v1 = vpop.eup %954 }
 0x2c0   :  { %v517_v3 = vsel %vm516_vm4, %v953_v50, %v513_v34  ;;  %v403_v8 = vmul.f32 %v955_v1, %v386_v53  ;;  %v923_v9 = vpop.permute.xlu1 %922  ;;  %v918_v10 = vpop.permute.xlu2 %917  ;;  %vm408_vm7 = vweird.f32 %v955_v1  ;;  %v29_v53 = vld [vmem:[%s1289_s2 + $0x28] sm:$0xff]  ;;  %s1013_s2 = smov 128  }
 0x2c1   :  { %v522_v13 = vsel %vm519_vm5, %v521_v2, %v517_v3  ;;  %v919_v15 = vunpack.i.l.bf16 %v918_v10  ;;  %v508_v17 = vpop.xlane.xlu0 %507  ;;  %v924_v18 = vunpack.i.l.bf16 %v923_v9  ;;  %v920_v21 = vunpack.i.h.bf16 %v918_v10  ;;  %vm409_vm9 = vmor %vm407_vm8, %vm408_vm7  ;;  %629 = vmatpush.msra.mxu0 %v29_v53 }
 0x2c2   :  { %v404_v19 = vsub.f32 1.0, %v403_v8  ;;  %956 = vrcp.f32 %v508_v17  ;;  %v925_v12 = vunpack.i.h.bf16 %v923_v9  ;;  %v523_v24 = vmul.f32 %v1137_v40, %v522_v13 }
 0x2c3   :  { %443 = vmatpush.msrb.mxu1 %v924_v18  ;;  %565 = vmatpush.msra.mxu2 %v919_v15  ;;  %v535_v33 = vand.u32 2147483648, %v508_v17  ;;  %v533_v36 = vand.u32 2147483647, %v508_v17  ;;  %vm529_vm12 = vweird.f32 %v508_v17  ;;  %v1215_v13 = vperm.slane %v1073_v6, 1 }
 0x2c4   :  { %v405_v23 = vmul.f32 %v955_v1, %v404_v19  ;;  %630 = vmatpush.msra.mxu0 %v28_v54  ;;  %v1011_v15 = vmov 32.0   ;;  %vm748_vm8 = vcmask 523264  }
 0x2c5   :  { %444 = vmatpush.msrb.mxu1 %v925_v12  ;;  %566 = vmatpush.msra.mxu2 %v920_v21  ;;  %v536_v38 = vor.u32 1.1754944e-38, %v535_v33  ;;  %vm534_vm14 = vcmp.eq.f32.partialorder %v533_v36, 8.507059e+37  ;;  %958 = vrcp.f32 %v1011_v15  ;;  %v700_v33 = vld [vmem:[%s1290_s3] sm:$0xff] }
 0x2c6   :  { %872 = vmatmul.msk.f32.vlgmr.msrb.gmra.mxu1 %vm124_vm6, %v401_v22  ;;  %878 = vmatmul.msk.f32.vlgmr.msra.gmra.mxu2 %vm124_vm6, %v523_v24  ;;  %v406_v27 = vadd.f32 %v955_v1, %v405_v23 }
 0x2c8   :  { %v957_v30 = vpop.eup %956  ;;  %v410_v31 = vsel %vm409_vm9, %v955_v1, %v406_v27 }
 0x2c9   :  { %v525_v32 = vmul.f32 %v957_v30, %v508_v17  ;;  %v415_v25 = vsel %vm412_vm10, %v414_v29, %v410_v31  ;;  %vm530_vm11 = vweird.f32 %v957_v30 }
 0x2ca   :  { %v416_v40 = vmul.f32 %v1142_v44, %v415_v25  ;;  %vm531_vm13 = vmor %vm529_vm12, %vm530_vm11  ;;  %v702_v25 = vld [vmem:[%s1290_s3 + $0x10] sm:$0xff] }
 0x2cb   :  { %v526_v16 = vsub.f32 1.0, %v525_v32  ;;  %v959_v17 = vpop.eup %958  ;;  %v703_v32 = vld [vmem:[%s1290_s3 + $0x18] sm:$0xff] }
 0x2cc   :  { %731 = vmatpush.msra.mxu1 %v703_v32 }
 0x2cd   :  { %v527_v35 = vmul.f32 %v957_v30, %v526_v16  ;;  %v701_v16 = vld [vmem:[%s1290_s3 + $0x8] sm:$0xff] }
 0x2ce   :  { %873 = vmatmul.msk.f32.gmra.mxu1 %vm124_vm6, %v416_v40 }
 0x2cf   :  { %v528_v37 = vadd.f32 %v957_v30, %v527_v35  ;;  %732 = vmatpush.msra.mxu1 %v702_v25 }
 0x2d1   :  { %v532_v39 = vsel %vm531_vm13, %v957_v30, %v528_v37  ;;  %733 = vmatpush.msra.mxu1 %v701_v16  ;;  %v711_v37 = vld [vmem:[%s1290_s3 + $0x58] sm:$0xff] }
 0x2d2   :  { %v537_v41 = vsel %vm534_vm14, %v536_v38, %v532_v39  ;;  %v710_v38 = vld [vmem:[%s1290_s3 + $0x50] sm:$0xff]  ;;  %v712_v39 = vperm.slane %v1073_v6, 2  ;;  %763 = vmatpush.msra.mxu3 %v711_v37  ;;  %v707_v6 = vld [vmem:[%s1290_s3 + $0x38] sm:$0xff] }
 0x2d3   :  { %v538_v42 = vmul.f32 %v1146_v46, %v537_v41  ;;  %734 = vmatpush.msra.mxu1 %v700_v33  ;;  %v709_v41 = vld [vmem:[%s1290_s3 + $0x48] sm:$0xff] }
 0x2d4   :  { %764 = vmatpush.msra.mxu3 %v710_v38 }
 0x2d5   :  { %879 = vmatmul.msk.f32.gmra.mxu2 %vm124_vm6, %v538_v42 }
 0x2d6   :  { %765 = vmatpush.msra.mxu3 %v709_v41 }
 0x31f   :  { %v202_v43 = vpop.f32.mrf.mxu2 }
 0x327   :  { %v205_v45 = vpop.f32.mrf.mxu2 }
 0x337   :  { %v324_v47 = vpop.f32.mrf.mxu2 }
 0x33f   :  { %v327_v44 = vpop.f32.mrf.mxu2 }
 0x343   :  { %v446_v48 = vpop.f32.mrf.mxu1 }
 0x344   :  { %584 = vrot.lane.b32.xlu1 %v446_v48, %s1007_s17 }
 0x349   :  { %v568_v49 = vpop.f32.mrf.mxu2 }
 0x34a   :  { %592 = vrot.lane.b32.xlu2 %v568_v49, %s1008_s18 }
 0x34b   :  { %v449_v50 = vpop.f32.mrf.mxu1 }
 0x34c   :  { %576 = vrot.lane.b32.xlu1 %v324_v47, %s1009_s19  ;;  %586 = vrot.lane.b32.xlu0 %v449_v50, %s1007_s17 }
 0x354   :  { %578 = vrot.lane.b32.xlu1 %v327_v44, %s1009_s19 }
 0x358   :  { %v571_v46 = vpop.f32.mrf.mxu2 }
 0x359   :  { %594 = vrot.lane.b32.xlu2 %v571_v46, %s1008_s18 }
 0x35c   :  { %606 = vrot.lane.b32.xlu1 %v1076_v7, %s1010_s20 }
 0x3a4   :  { %v593_v56 = vpop.permute.xlu2 %592 }
 0x3b3   :  { %v595_v14 = vpop.permute.xlu2 %594 }
 0x3b6   :  { %v585_v7 = vpop.permute.xlu1 %584 }
 0x3be   :  { %v577_v55 = vpop.permute.xlu1 %576  ;;  %v587_v60 = vpop.permute.xlu0 %586 }
 0x3bf   :  { %v598_v28 = vsel %vm90_vm1, %v202_v43, %v577_v55 }
 0x3c0   :  { %v600_v57 = vsel %vm124_vm6, %v598_v28, %v585_v7 }
 0x3c1   :  { %v603_v58 = vsel %vm602_vm15, %v600_v57, %v593_v56 }
 0x3c2   :  { %880 = vmatmul.msk.f32.vlgmr.msra.gmra.mxu0 %vm33_vm0, %v603_v58 }
 0x3c6   :  { %v579_v59 = vpop.permute.xlu1 %578 }
 0x3c7   :  { %v599_v61 = vsel %vm90_vm1, %v205_v45, %v579_v59  ;;  %vm651_vm1 = vweird.f32 %v959_v17  ;;  %v708_v45 = vld [vmem:[%s1290_s3 + $0x40] sm:$0xff] }
 0x3c8   :  { %v601_v62 = vsel %vm124_vm6, %v599_v61, %v587_v60  ;;  %766 = vmatpush.msra.mxu3 %v708_v45 }
 0x3c9   :  { %v604_v63 = vsel %vm602_vm15, %v601_v62, %v595_v14 }
 0x3ca   :  { %881 = vmatmul.msk.f32.gmra.mxu0 %vm33_vm0, %v604_v63  ;;  %767 = vmatpush.msra.mxu3 %v707_v6 }
 0x3ce   :  { %v607_v0 = vpop.permute.xlu1 %606 }
 0x43f   :  { %v632_v34 = vpop.f32.mrf.mxu0 }
 0x440   :  { %v633_v1 = vadd.f32 %v632_v34, %v607_v0  ;;  %v705_v34 = vld [vmem:[%s1290_s3 + $0x28] sm:$0xff] }
 0x442   :  { %v638_v2 = vadd.f32 %v633_v1, %v1059_v4  ;;  %v647_v4 = vmul.f32 32.0, %v959_v17  ;;  %v704_v1 = vld [vmem:[%s1290_s3 + $0x20] sm:$0xff] }
 0x444   :  { %v640_v3 = vsel %vm33_vm0, %v638_v2, 0.0  ;;  %v648_v18 = vsub.f32 1.0, %v647_v4 }
 0x445   :  { %641 = vadd.xlane.f32.xlu2 %v640_v3 }
 0x446   :  { %v649_v19 = vmul.f32 %v959_v17, %v648_v18 }
 0x447   :  { %v635_v8 = vpop.f32.mrf.mxu0 }
 0x448   :  { %v636_v9 = vadd.f32 %v635_v8, %v607_v0  ;;  %v650_v20 = vadd.f32 %v959_v17, %v649_v19  ;;  %v706_v0 = vld [vmem:[%s1290_s3 + $0x30] sm:$0xff] }
 0x449   :  { %768 = vmatpush.msra.mxu3 %v706_v0 }
 0x44a   :  { %v639_v10 = vadd.f32 %v636_v9, %v1066_v5  ;;  %v1219_v21 = vsel %vm651_vm1, %v959_v17, %v650_v20 }
 0x44b   :  { %769 = vmatpush.msra.mxu3 %v705_v34 }
 0x44c   :  { %v643_v11 = vsel %vm33_vm0, %v639_v10, 0.0 }
 0x44d   :  { %644 = vadd.xlane.f32.xlu1 %v643_v11  ;;  %770 = vmatpush.msra.mxu3 %v704_v1 }
 0x466   :  { %695 = vrot.lane.b32.xlu1 %v1215_v13, %s996_s8 }
 0x4b8   :  { %v642_v5 = vpop.xlane.xlu2 %641 }
 0x4b9   :  { %v653_v12 = vmul.f32 %v1219_v21, %v642_v5 }
 0x4bb   :  { %v655_v22 = vsub.f32 %v638_v2, %v653_v12 }
 0x4bd   :  { %v657_v23 = vmul.f32 %v655_v22, %v655_v22 }
 0x4bf   :  { %v659_v24 = vsel %vm33_vm0, %v657_v23, 0.0 }
 0x4c0   :  { %v645_v26 = vpop.xlane.xlu1 %644  ;;  %660 = vadd.xlane.f32.xlu0 %v659_v24 }
 0x4c1   :  { %v654_v27 = vmul.f32 %v1219_v21, %v645_v26 }
 0x4c3   :  { %v656_v29 = vsub.f32 %v639_v10, %v654_v27 }
 0x4c5   :  { %v658_v30 = vmul.f32 %v656_v29, %v656_v29 }
 0x4c7   :  { %v662_v31 = vsel %vm33_vm0, %v658_v30, 0.0 }
 0x4c8   :  { %663 = vadd.xlane.f32.xlu2 %v662_v31 }
 0x4d8   :  { %v696_v56 = vpop.permute.xlu1 %695 }
 0x4e0   :  { %745 = vrot.lane.b32.xlu2 %v712_v39, %s1004_s14 }
 0x4e8   :  { %824 = vrot.lane.b32.xlu2 %v1215_v13, %s1004_s14 }
 0x533   :  { %v661_v40 = vpop.xlane.xlu0 %660 }
 0x534   :  { %v665_v35 = vmul.f32 %v661_v40, %v1219_v21 }
 0x536   :  { %v667_v36 = vadd.f32 1e-05, %v665_v35 }
 0x538   :  { %960 = vrsqrt.f32 %v667_v36  ;;  %vm675_vm2 = vweird.f32 %v667_v36 }
 0x53b   :  { %v664_v42 = vpop.xlane.xlu2 %663 }
 0x53c   :  { %v666_v43 = vmul.f32 %v664_v42, %v1219_v21 }
 0x53e   :  { %v961_v47 = vpop.eup %960  ;;  %v668_v44 = vadd.f32 1e-05, %v666_v43 }
 0x53f   :  { %v670_v48 = vmul.f32 %v961_v47, %v667_v36  ;;  %vm676_vm6 = vweird.f32 %v961_v47 }
 0x540   :  { %962 = vrsqrt.f32 %v668_v44  ;;  %vm677_vm3 = vmor %vm675_vm2, %vm676_vm6  ;;  %vm685_vm5 = vweird.f32 %v668_v44 }
 0x541   :  { %v671_v49 = vmul.f32 %v961_v47, %v670_v48 }
 0x543   :  { %v672_v50 = vmul.f32 0.5, %v671_v49  ;;  %v746_v15 = vpop.permute.xlu2 %745 }
 0x545   :  { %v673_v46 = vsub.f32 1.5, %v672_v50 }
 0x546   :  { %v963_v51 = vpop.eup %962 }
 0x547   :  { %v674_v52 = vmul.f32 %v961_v47, %v673_v46  ;;  %v680_v53 = vmul.f32 %v963_v51, %v668_v44  ;;  %vm686_vm4 = vweird.f32 %v963_v51 }
 0x548   :  { %vm687_vm7 = vmor %vm685_vm5, %vm686_vm4 }
 0x549   :  { %v681_v54 = vmul.f32 %v963_v51, %v680_v53  ;;  %v678_v7 = vsel %vm677_vm3, %v961_v47, %v674_v52 }
 0x54a   :  { %v689_v55 = vmul.f32 %v678_v7, %v655_v22 }
 0x54b   :  { %v682_v28 = vmul.f32 0.5, %v681_v54  ;;  %v825_v49 = vpop.permute.xlu2 %824 }
 0x54c   :  { %v692_v57 = vmul.f32 %v1215_v13, %v689_v55 }
 0x54d   :  { %v683_v58 = vsub.f32 1.5, %v682_v28 }
 0x54e   :  { %v698_v59 = vadd.f32 %v696_v56, %v692_v57 }
 0x54f   :  { %v684_v60 = vmul.f32 %v963_v51, %v683_v58 }
 0x550   :  { %882 = vmatmul.msk.f32.vlgmr.msra.gmra.mxu1 %vm33_vm0, %v698_v59 }
 0x551   :  { %v688_v61 = vsel %vm687_vm7, %v963_v51, %v684_v60 }
 0x552   :  { %v690_v14 = vmul.f32 %v688_v61, %v656_v29 }
 0x554   :  { %v693_v62 = vmul.f32 %v1215_v13, %v690_v14 }
 0x556   :  { %v699_v63 = vadd.f32 %v696_v56, %v693_v62 }
 0x558   :  { %883 = vmatmul.msk.f32.gmra.mxu1 %vm33_vm0, %v699_v63 }
 0x5cd   :  { %v736_v2 = vpop.f32.mrf.mxu1 }
 0x5ce   :  { %v737_v3 = vadd.f32 %v736_v2, %v712_v39 }
 0x5d0   :  { %v742_v8 = vmax.f32 %v737_v3, 0.0 }
 0x5d2   :  { %884 = vmatmul.msk.f32.vlgmr.msra.gmra.mxu3 %vm748_vm8, %v742_v8 }
 0x5d5   :  { %v739_v9 = vpop.f32.mrf.mxu1 }
 0x5d6   :  { %v740_v10 = vadd.f32 %v739_v9, %v712_v39 }
 0x5d8   :  { %v743_v11 = vmax.f32 %v740_v10, 0.0 }
 0x5da   :  { %885 = vmatmul.msk.f32.gmra.mxu3 %vm748_vm8, %v743_v11 }
 0x655   :  { %v772_v17 = vpop.f32.mrf.mxu3 }
 0x656   :  { %v773_v4 = vadd.f32 %v772_v17, %v746_v15 }
 0x658   :  { %v778_v18 = vadd.f32 %v773_v4, %v698_v59 }
 0x65a   :  { %v780_v19 = vsel %vm33_vm0, %v778_v18, 0.0 }
 0x65b   :  { %781 = vadd.xlane.f32.xlu0 %v780_v19 }
 0x65d   :  { %v775_v20 = vpop.f32.mrf.mxu3 }
 0x65e   :  { %v776_v5 = vadd.f32 %v775_v20, %v746_v15 }
 0x660   :  { %v779_v12 = vadd.f32 %v776_v5, %v699_v63 }
 0x662   :  { %v783_v22 = vsel %vm33_vm0, %v779_v12, 0.0 }
 0x663   :  { %784 = vadd.xlane.f32.xlu0 %v783_v22 }
 0x6ce   :  { %v782_v23 = vpop.xlane.xlu0 %781 }
 0x6cf   :  { %v786_v24 = vmul.f32 %v782_v23, %v1219_v21 }
 0x6d1   :  { %v788_v26 = vsub.f32 %v778_v18, %v786_v24 }
 0x6d3   :  { %v790_v27 = vmul.f32 %v788_v26, %v788_v26 }
 0x6d5   :  { %v792_v29 = vsel %vm33_vm0, %v790_v27, 0.0 }
 0x6d6   :  { %793 = vadd.xlane.f32.xlu0 %v792_v29  ;;  %v785_v30 = vpop.xlane.xlu0 %784 }
 0x6d7   :  { %v787_v31 = vmul.f32 %v785_v30, %v1219_v21 }
 0x6d9   :  { %v789_v32 = vsub.f32 %v779_v12, %v787_v31 }
 0x6db   :  { %v791_v25 = vmul.f32 %v789_v32, %v789_v32 }
 0x6dd   :  { %v795_v16 = vsel %vm33_vm0, %v791_v25, 0.0 }
 0x6de   :  { %796 = vadd.xlane.f32.xlu1 %v795_v16 }
 0x6ea   :  { %829 = vrot.lane.b32.xlu0 %v1215_v13, %s1010_s20 }
 0x749   :  { %v794_v33 = vpop.xlane.xlu0 %793 }
 0x74a   :  { %v798_v40 = vmul.f32 %v794_v33, %v1219_v21 }
 0x74c   :  { %v800_v35 = vadd.f32 1e-05, %v798_v40 }
 0x74e   :  { %964 = vrsqrt.f32 %v800_v35  ;;  %vm808_vm10 = vweird.f32 %v800_v35 }
 0x751   :  { %v797_v36 = vpop.xlane.xlu1 %796 }
 0x752   :  { %v799_v37 = vmul.f32 %v797_v36, %v1219_v21 }
 0x754   :  { %v965_v38 = vpop.eup %964  ;;  %v801_v39 = vadd.f32 1e-05, %v799_v37 }
 0x755   :  { %v803_v41 = vmul.f32 %v965_v38, %v800_v35  ;;  %vm809_vm9 = vweird.f32 %v965_v38 }
 0x756   :  { %966 = vrsqrt.f32 %v801_v39  ;;  %vm810_vm11 = vmor %vm808_vm10, %vm809_vm9  ;;  %vm818_vm13 = vweird.f32 %v801_v39 }
 0x757   :  { %v804_v42 = vmul.f32 %v965_v38, %v803_v41 }
 0x759   :  { %v805_v43 = vmul.f32 0.5, %v804_v42 }
 0x75b   :  { %v806_v45 = vsub.f32 1.5, %v805_v43 }
 0x75c   :  { %v967_v47 = vpop.eup %966  ;;  %v830_v51 = vpop.permute.xlu0 %829 }
 0x75d   :  { %v813_v44 = vmul.f32 %v967_v47, %v801_v39  ;;  %v807_v13 = vmul.f32 %v965_v38, %v806_v45  ;;  %vm819_vm12 = vweird.f32 %v967_v47 }
 0x75e   :  { %vm820_vm14 = vmor %vm818_vm13, %vm819_vm12 }
 0x75f   :  { %v814_v6 = vmul.f32 %v967_v47, %v813_v44  ;;  %v811_v48 = vsel %vm810_vm11, %v965_v38, %v807_v13 }
 0x760   :  { %v822_v50 = vmul.f32 %v811_v48, %v788_v26 }
 0x761   :  { %v815_v46 = vmul.f32 0.5, %v814_v6 }
 0x762   :  { %v827_v21 = vmul.f32 %v825_v49, %v822_v50 }
 0x763   :  { %v816_v52 = vsub.f32 1.5, %v815_v46 }
 0x764   :  { %v832_v53 = vadd.f32 %v830_v51, %v827_v21 }
 0x765   :  { %v817_v54 = vmul.f32 %v967_v47, %v816_v52 }
 0x766   :  { %834 = vst.msk [vmem:[#allocation2] sm:$0xff] %vm33_vm0, %v832_v53 }
 0x767   :  { %v821_v7 = vsel %vm820_vm14, %v967_v47, %v817_v54 }
 0x768   :  { %v823_v55 = vmul.f32 %v821_v7, %v789_v32 }
 0x76a   :  { %v828_v28 = vmul.f32 %v825_v49, %v823_v55 }
 0x76c   :  { %v833_v56 = vadd.f32 %v830_v51, %v828_v28 }
 0x76e   :  { %835 = vst.msk [vmem:[#allocation2 + $0x8] sm:$0xff] %vm33_vm0, %v833_v56 }
 0x76f   :  { %848 = dma.vmem_to_hbm [thread:$0]  %s841_s28, 256, %s843_s26, [#allocation3], %s1013_s2, %s1013_s2, %s1009_s19  }
 0x770   :  { %992 = dma.done.wait [#allocation3], 256  }
 0x771   :  { %993 = vsyncadd [#allocation3], 4294967040 }
 0x772   :  { %853 = vsyncpa [#allocation3], 1 }

</bundles_post_ra>
